<compile_context>
chip_gen: v7x
topology: tpu7x:2x2x1
jax: 0.10.0
libtpu: 0.0.40
codegen_flags: <defaults>
</compile_context>

<pallas_src>
import functools

import jax
import jax.numpy as jnp
from jax import lax
from jax.experimental import pallas as pl
from jax.experimental.pallas import tpu as pltpu


def _round_up(x: int, m: int) -> int:
    return ((x + m - 1) // m) * m


def _coverage_loss_kernel(phi_ref, reads_ref, cov_ref, loc_ref, out_ref, *,
                          tb: int, n: int, chunk: int, b_true: int,
                          mask_tail: bool):
    """One grid step: accumulate sum(log(arg) * cov * reads) over a (tb, n) tile.

    Emits a lane-dense (8, n) f32 partial; sign flip + mean happen in wrapper.
    """
    i = pl.program_id(0)
    row0 = i * tb

    loc = loc_ref[...].astype(jnp.float32)        # (1, n), DMA'd once (constant index_map)
    coeff = 1.0 - 2.0 * loc                       # (1, n), computed once per grid step

    num_chunks = tb // chunk

    def body(c, acc):
        r = pl.multiple_of(c * chunk, chunk)
        phi = phi_ref[pl.ds(r, chunk), :].astype(jnp.float32)      # (chunk, 1)
        reads = reads_ref[pl.ds(r, chunk), :].astype(jnp.float32)  # (chunk, 1)
        cov = cov_ref[pl.ds(r, chunk), :].astype(jnp.float32)      # (chunk, n)

        # loss = -log(1 + phi - 2*phi*loc) = -log(1 + phi*(1 - 2*loc)).
        # Accumulate +log here; the single negation happens in the wrapper.
        arg = 1.0 + phi * coeff                                    # (chunk, n)
        w = jnp.log(arg) * (cov * reads)                           # (chunk, n)

        if mask_tail:
            # Last (ragged) block: rows >= B hold unspecified VMEM data; select
            # exactly 0 for them (jnp.where does not propagate NaN/inf from the
            # unselected branch).
            rows = row0 + r + lax.broadcasted_iota(jnp.int32, (chunk, 1), 0)
            w = jnp.where(rows < b_true, w, 0.0)

        # Fold chunk rows into (8, n) with pure VPU vreg-vreg adds
        # (layout-trivial reshape; no cross-lane XLU work per step).
        folded = w.reshape(chunk // 8, 8, n).sum(axis=0)
        return acc + folded

    acc = lax.fori_loop(0, num_chunks, body,
                        jnp.zeros((8, n), jnp.float32),
                        unroll=min(8, num_chunks))
    out_ref[0, :, :] = acc


def make_locations(num_position_coverage: int = 100) -> jnp.ndarray:
    # torch.linspace(1/(2N), 1 - 1/(2N), steps=N).unsqueeze(0)
    n = num_position_coverage
    loc = jnp.linspace(1.0 / (2 * n), 1.0 - 1.0 / (2 * n), n, dtype=jnp.float32)
    return loc.reshape(1, n)


def coverage_loss(phi, num_intronic_reads, coverage, locations, *,
                  tb: int = 4096, chunk: int = 128):
    """phi: (B,), num_intronic_reads: (B,), coverage: (B, N), locations: (1, N)."""
    B, N = coverage.shape

    # Row-chunk size for the in-kernel accumulation loop (multiple of 8).
    chunk = _round_up(min(chunk, _round_up(B, 8)), 8)
    # Batch tile: as large as useful, a multiple of the chunk, never bloated
    # past round_up(B, 8) for small B.
    tb_eff = max(chunk, min(tb, _round_up(B, 8)))
    tb_eff = _round_up(tb_eff, chunk)

    num_blocks = pl.cdiv(B, tb_eff)
    mask_tail = (B % tb_eff) != 0          # compile tail mask only if needed

    phi2 = phi.reshape(B, 1)               # cheap layout reshapes, no data pass
    reads2 = num_intronic_reads.reshape(B, 1)
    loc2 = locations.reshape(1, N)

    kernel = functools.partial(_coverage_loss_kernel,
                               tb=tb_eff, n=N, chunk=chunk,
                               b_true=B, mask_tail=mask_tail)

    # Double-buffered working set (coverage dominates) + headroom; explicit so
    # large tiles stay safe under v5e's 16 MiB default scoped VMEM, capped well
    # under v7x's 64 MiB physical VMEM.
    step_bytes = 4 * tb_eff * (N + 2) + 4 * (N + 8 * N)
    vmem_limit = int(min(max(4 * step_bytes + (2 << 20), 8 << 20), 48 << 20))

    partials = pl.pallas_call(
        kernel,
        out_shape=jax.ShapeDtypeStruct((num_blocks, 8, N), jnp.float32),
        grid=(num_blocks,),
        in_specs=[
            pl.BlockSpec((tb_eff, 1), lambda i: (i, 0)),     # phi
            pl.BlockSpec((tb_eff, 1), lambda i: (i, 0)),     # num_intronic_reads
            pl.BlockSpec((tb_eff, N), lambda i: (i, 0)),     # coverage (no padding)
            pl.BlockSpec((1, N), lambda i: (0, 0)),          # locations (revisited, 1 DMA)
        ],
        out_specs=pl.BlockSpec((1, 8, N), lambda i: (i, 0, 0)),  # lane-dense partials
        compiler_params=pltpu.CompilerParams(
            dimension_semantics=("parallel",),
            vmem_limit_bytes=vmem_limit,
        ),
    )(phi2, reads2, coverage, loc2)

    # Tiny cross-block reduction, single sign flip, divide by the TRUE B*N.
    return -jnp.sum(partials) / jnp.float32(B * N)


def coverage_loss_ref(phi, num_intronic_reads, coverage, locations):
    """Pure-JAX reference mirroring the PyTorch forward."""
    loss = -jnp.log(1.0 + phi[:, None] - 2.0 * phi[:, None] * locations)
    return jnp.mean(loss * coverage * num_intronic_reads[:, None])


if __name__ == "__main__":
    num_position_coverage = 100
    B = 8

    key = jax.random.PRNGKey(0)
    k_phi, k_reads, k_cov = jax.random.split(key, 3)

    # phi in (0, 1) keeps the log argument strictly positive (as in training).
    phi = jax.random.uniform(k_phi, (B,), dtype=jnp.float32, minval=0.05, maxval=0.95)
    num_intronic_reads = jax.random.uniform(
        k_reads, (B,), dtype=jnp.float32, minval=1.0, maxval=50.0
    )
    coverage = jax.random.uniform(
        k_cov, (B, num_position_coverage), dtype=jnp.float32, minval=0.0, maxval=1.0
    )
    locations = make_locations(num_position_coverage)

    out = coverage_loss(phi, num_intronic_reads, coverage, locations)
    out = jax.block_until_ready(out)

    ref = coverage_loss_ref(phi, num_intronic_reads, coverage, locations)
    assert jnp.allclose(out, ref, rtol=1e-5, atol=1e-5), (out, ref)

    print("KERNEL_OK")
</pallas_src>

<mosaic_0001>
module attributes {stable_mosaic.version = 11 : i64} {
  func.func @_coverage_loss_kernel(%arg0: i32, %arg1: memref<8x1xf32, #tpu.memory_space<vmem>>, %arg2: memref<8x1xf32, #tpu.memory_space<vmem>>, %arg3: memref<8x100xf32, #tpu.memory_space<vmem>>, %arg4: memref<1x100xf32, #tpu.memory_space<vmem>>, %arg5: memref<1x8x100xf32, #tpu.memory_space<vmem>>) attributes {dimension_semantics = [#tpu.dimension_semantics<parallel>], iteration_bounds = array<i64: 1>, scalar_prefetch = 0 : i64, scratch_operands = 0 : i64, tpu.core_type = #tpu.core_type<tc>, window_params = [{transform_indices = @transform_0, window_bounds = array<i64: 8, 1>}, {transform_indices = @transform_1, window_bounds = array<i64: 8, 1>}, {transform_indices = @transform_2, window_bounds = array<i64: 8, 100>}, {pipeline_mode = #tpu.pipeline_mode<synchronous>, transform_indices = @transform_3, window_bounds = array<i64: 1, 100>}, {transform_indices = @transform_4, window_bounds = array<i64: 1, 8, 100>}]} {
    %c0 = arith.constant 0 : index
    %c0_0 = arith.constant 0 : index
    %0 = vector.load %arg4[%c0, %c0_0] : memref<1x100xf32, #tpu.memory_space<vmem>>, vector<1x100xf32>
    %cst = arith.constant 2.000000e+00 : f32
    %1 = vector.broadcast %cst : f32 to vector<1x100xf32>
    %2 = arith.mulf %1, %0 : vector<1x100xf32>
    %cst_1 = arith.constant 1.000000e+00 : f32
    %3 = vector.broadcast %cst_1 : f32 to vector<1x100xf32>
    %4 = arith.subf %3, %2 : vector<1x100xf32>
    %cst_2 = arith.constant 0.000000e+00 : f32
    %5 = vector.broadcast %cst_2 : f32 to vector<8x100xf32>
    %c0_i32 = arith.constant 0 : i32
    %c8_i32 = arith.constant 8 : i32
    %6 = arith.muli %c0_i32, %c8_i32 : i32
    %7 = tpu.assume_multiple %6, 8 : i32
    %8 = arith.index_cast %7 : i32 to index
    %c0_3 = arith.constant 0 : index
    %9 = vector.load %arg1[%8, %c0_3] : memref<8x1xf32, #tpu.memory_space<vmem>>, vector<8x1xf32>
    %10 = arith.index_cast %7 : i32 to index
    %c0_4 = arith.constant 0 : index
    %11 = vector.load %arg2[%10, %c0_4] : memref<8x1xf32, #tpu.memory_space<vmem>>, vector<8x1xf32>
    %12 = arith.index_cast %7 : i32 to index
    %c0_5 = arith.constant 0 : index
    %13 = vector.load %arg3[%12, %c0_5] : memref<8x100xf32, #tpu.memory_space<vmem>>, vector<8x100xf32>
    %14 = vector.broadcast %9 : vector<8x1xf32> to vector<8x100xf32>
    %15 = vector.broadcast %4 : vector<1x100xf32> to vector<8x100xf32>
    %16 = arith.mulf %14, %15 : vector<8x100xf32>
    %cst_6 = arith.constant 1.000000e+00 : f32
    %17 = vector.broadcast %cst_6 : f32 to vector<8x100xf32>
    %18 = arith.addf %17, %16 : vector<8x100xf32>
    %19 = math.log %18 : vector<8x100xf32>
    %20 = vector.broadcast %11 : vector<8x1xf32> to vector<8x100xf32>
    %21 = arith.mulf %13, %20 : vector<8x100xf32>
    %22 = arith.mulf %19, %21 : vector<8x100xf32>
    %23 = vector.shape_cast %22 : vector<8x100xf32> to vector<1x8x100xf32>
    %cst_7 = arith.constant dense<0.000000e+00> : vector<8x100xf32>
    %24 = vector.multi_reduction <add>, %23, %cst_7 [0] : vector<1x8x100xf32> to vector<8x100xf32>
    %25 = arith.addf %5, %24 : vector<8x100xf32>
    %c1_i32 = arith.constant 1 : i32
    %c0_8 = arith.constant 0 : index
    %c0_9 = arith.constant 0 : index
    %c0_10 = arith.constant 0 : index
    %26 = vector.load %arg5[%c0_8, %c0_9, %c0_10] : memref<1x8x100xf32, #tpu.memory_space<vmem>>, vector<1x8x100xf32>
    %27 = vector.shape_cast %26 : vector<1x8x100xf32> to vector<8x100xf32>
    %28 = vector.shape_cast %25 : vector<8x100xf32> to vector<1x8x100xf32>
    tpu.vector_store %arg5[%c0_8, %c0_9, %c0_10], %28 {strides = array<i32>} : memref<1x8x100xf32, #tpu.memory_space<vmem>>, vector<1x8x100xf32>,
    return
  }
  func.func @transform_0(%arg0: i32) -> (i32, i32) {
    %c0_i32 = arith.constant 0 : i32
    %c0_i32_0 = arith.constant 0 : i32
    return %arg0, %c0_i32 : i32, i32
  }
  func.func @transform_1(%arg0: i32) -> (i32, i32) {
    %c0_i32 = arith.constant 0 : i32
    %c0_i32_0 = arith.constant 0 : i32
    return %arg0, %c0_i32 : i32, i32
  }
  func.func @transform_2(%arg0: i32) -> (i32, i32) {
    %c0_i32 = arith.constant 0 : i32
    %c0_i32_0 = arith.constant 0 : i32
    return %arg0, %c0_i32 : i32, i32
  }
  func.func @transform_3(%arg0: i32) -> (i32, i32) {
    %c0_i32 = arith.constant 0 : i32
    %c0_i32_0 = arith.constant 0 : i32
    %c0_i32_1 = arith.constant 0 : i32
    return %c0_i32, %c0_i32_0 : i32, i32
  }
  func.func @transform_4(%arg0: i32) -> (i32, i32, i32) {
    %c0_i32 = arith.constant 0 : i32
    %c0_i32_0 = arith.constant 0 : i32
    %c0_i32_1 = arith.constant 0 : i32
    return %arg0, %c0_i32, %c0_i32_0 : i32, i32, i32
  }
}

</mosaic_0001>

<bundles_post_ra>
// kernel: tpu_custom_call.1
= control target key start
LH: loop header
LB: loop body
LE: loop exit
PB: predicated region body
PF: predicated region fallthrough
CT: control target
= control target key end

     0   :  { %v93_v1 = vmov 0   ;;  %s144_s0 = inlined_call_operand.vmem [shape: f32[8,1], index: 0, kind: input, shape index: {}]   ;;  %s145_s1 = inlined_call_operand.vmem [shape: f32[8,1], index: 1, kind: input, shape index: {}]   ;;  %s146_s2 = inlined_call_operand.vmem [shape: f32[8,100], index: 2, kind: input, shape index: {}]   ;;  %s147_s3 = inlined_call_operand.vmem [shape: f32[1,100], index: 3, kind: input, shape index: {}]   ;;  %s148_s4 = inlined_call_operand.hbm [shape: f32[1,8,100], index: 4, kind: output, shape index: {}]  }
   0x1   :  { %v21_v0 = vld [vmem:[%s144_s0] sm:$0xff]  ;;  %66 = vset.pattern.permute.xlu0 %v93_v1 }
   0x2   :  { %9 = vsyncpa [#allocation3], 0  ;;  %26 = vperm.xlu0 %66, %v21_v0   ;;  %v22_v2 = vld [vmem:[%s145_s1] sm:$0xff]  ;;  %v30_v3 = vlaneseq  ;;  %s94_s1 = smov [#allocation2]   ;;  %vm48_vm0 = vcmask 818176  }
   0x3   :  { %v18_v4 = vld [vmem:[%s147_s3] sm:$0x1]  ;;  %s56_s22 = sshll.u32 %s94_s1, 4  ;;  %s57_s22 = int_to_ptr.vmem [resolvable:$true] %s56_s22 }
   0x4   :  { %v31_v5 = vshrl.u32 %v30_v3, 7  ;;  %v19_v6 = vmul.f32 2.0, %v18_v4  ;;  %v23_v13 = vld [vmem:[%s146_s2] sm:$0xff]  ;;  %s69_s3 = scalar_lea.vmem %s57_s22, 128  ;;  %p74_p1 = scmp.lt.s32.totalorder %s57_s22, %s57_s22 }
   0x5   :  { %p70_p0 = scmp.ne.s32.totalorder %s57_s22, %s69_s3  ;;  %p75_p2 = scmp.lt.s32.totalorder %s69_s3, %s69_s3 }
   0x6   :  { %41 = vperm.xlu0 %66, %v22_v2   ;;  %v32_v7 = vsub.s32 0, %v31_v5  ;;  %v20_v8 = vsub.f32 1.0, %v19_v6 }
   0x7   :  { %p76_p3 = por %p75_p2, %p74_p1 }
   0x8   :  { %v33_v9 = vrot.slane %v20_v8, %v32_v7 }
   0x9   :  { %p77_p4 = pnand %p76_p3, %p70_p0 }
  0x81   :  { %v27_v10 = vpop.permute.xlu0 %26 }
  0x82   :  { %v35_v11 = vmul.f32 %v33_v9, %v27_v10 }
  0x84   :  { %v36_v12 = vadd.f32 1.0, %v35_v11 }
  0x85   :  { %v42_v14 = vpop.permute.xlu0 %41 }
  0x86   :  { %67 = vlog2.f32 %v36_v12  ;;  %v44_v17 = vmul.f32 %v42_v14, %v23_v13 }
  0x90   :  { %v68_v15 = vpop.eup %67 }
  0x91   :  { %v38_v16 = vmul.f32 0.6931472, %v68_v15 }
  0x93   :  { %v45_v18 = vmul.f32 %v44_v17, %v38_v16 }
  0x95   :  { %49 = vst.msk [vmem:[#allocation2] sm:$0xff] %vm48_vm0, %v45_v18 }
  0x96   :  { %80 = shalt.err (!%p77_p4)
}
  0x97   :  { %s81_s2 = scalar_lea.hbm %s148_s4, 128 }
  0x98   :  { %p82_p5 = scmp.ne.s32.totalorder %s148_s4, %s81_s2  ;;  %p85_p6 = scmp.lt.u32.totalorder %s81_s2, %s148_s4 }
  0x9a   :  { %p87_p7 = pnand %p85_p6, %p82_p5 }
  0x9c   :  { %90 = shalt.err (!%p87_p7)
}
  0x9d   :  { %59 = dma.vmem_to_hbm [thread:$0]  %s57_s22, 128, %s148_s4, [#allocation3]  }
  0x9e   :  { %91 = dma.done.wait [#allocation3], 128  }
  0x9f   :  { %92 = vsyncadd [#allocation3], 4294967168 }
  0xa0   :  { %63 = vsyncpa [#allocation3], 1 }

</bundles_post_ra>
